<compile_context>
chip_gen: v7x
topology: tpu7x:2x2x1
jax: 0.10.0
libtpu: 0.0.40
codegen_flags: <defaults>
</compile_context>

<pallas_src>
import functools

import jax
import jax.numpy as jnp
from jax.experimental import pallas as pl
from jax.experimental.pallas import tpu as pltpu


def _self_attn_pool_kernel(x_ref, w1_ref, w2_ref, out_ref, *, epilogue_dtype):
    # x_ref:  (TB, S, E)  one batch block, native activation dtype
    # w1_ref: (E, A)      pre-transposed W1, native activation dtype (resident)
    # w2_ref: (1, A)      f32 (resident)
    # out_ref:(TB, E)
    tb, s, e = x_ref.shape
    a = w1_ref.shape[1]

    x = x_ref[...]                                     # native dtype for the MXU
    w1 = w1_ref[...]                                   # (E, A)
    w2 = w2_ref[...].astype(epilogue_dtype)            # (1, A)

    # scores = tanh(x @ W1^T): a single dense (TB*S, E) @ (E, A) MXU pass.
    x2d = x.reshape(tb * s, e)
    scores = jnp.tanh(
        jnp.dot(x2d, w1, preferred_element_type=jnp.float32).astype(epilogue_dtype)
    )                                                  # (TB*S, A)

    # logits = scores @ W2^T as a lane reduction over A, keeping a lane-dense
    # (TB, S) layout for the softmax; accumulate the reduction in f32.
    logits = jnp.sum(
        (scores.reshape(tb, s, a) * w2[jnp.newaxis, :, :]).astype(jnp.float32),
        axis=-1,
    )                                                  # (TB, S), f32

    # Numerically stable softmax over S.  Normalization is deferred to the
    # pooled output, so the divide is exact f32 and touches only TB*E values.
    m = jnp.max(logits, axis=-1, keepdims=True)        # (TB, 1)
    e_l = jnp.exp(logits - m)                          # (TB, S), values in (0, 1]
    denom = jnp.sum(e_l, axis=-1, keepdims=True)       # (TB, 1), >= 1

    # Un-normalized pool on the otherwise-idle MXU:
    # (TB, 1, S) @ (TB, S, E) -> (TB, 1, E), f32 accumulation.
    pooled = jnp.einsum(
        "bqs,bse->bqe",
        e_l[:, jnp.newaxis, :].astype(x.dtype),
        x,
        preferred_element_type=jnp.float32,
    )[:, 0, :]                                         # (TB, E), f32

    out_ref[...] = (pooled / denom).astype(out_ref.dtype)


def self_attention_pooling(x, w1, w2, *, block_b=None, vmem_limit_bytes=None,
                           epilogue_dtype=None):
    """SelfAttentionPooling forward.

    x:  (B, S, E)  activations (f32 or bf16)
    w1: (A, E)     first Linear weight (bias-free)
    w2: (1, A)     second Linear weight (bias-free)
    Returns pooled: (B, E) in x.dtype.
    """
    B, S, E = x.shape
    A = w1.shape[0]
    assert w1.shape == (A, E), w1.shape
    assert w2.shape == (1, A), w2.shape

    if vmem_limit_bytes is None:
        # Explicit scoped-VMEM limit: comfortably under v7x's 64 MiB physical
        # VMEM and free headroom over v5e's 16 MiB / v6e's 32 MiB defaults.
        vmem_limit_bytes = 48 * 1024 * 1024

    if epilogue_dtype is None:
        # bf16 tanh/VPU epilogue when activations are bf16 (v6e/v7x have bf16
        # VPU/EUP); keep f32 otherwise (and on v5e, which has neither).
        epilogue_dtype = jnp.bfloat16 if x.dtype == jnp.bfloat16 else jnp.float32

    itemsize = x.dtype.itemsize

    if block_b is None:
        # Target an ~8 MiB x tile (double-buffered by the input pipeline), then
        #   (a) cap so the grid keeps >= 4 steps when the batch is big enough
        #       (DMA/compute overlap + v7x megacore sharding), and
        #   (b) cap by an explicit per-step VMEM budget.
        per_example_x = max(1, S * E * itemsize)
        block_b = max(1, (8 * 1024 * 1024) // per_example_x)
        if B >= 32:
            block_b = min(block_b, -(-B // 4))
        per_example_vmem = (2 * S * E * itemsize        # double-buffered x tile
                            + S * A * 4                 # f32 scores intermediate
                            + 8 * S                     # logits / exp rows
                            + 2 * E * itemsize)         # double-buffered out
        fixed_vmem = 2 * (E * A * itemsize + A * 4)     # W1^T and W2 buffers
        budget = int(0.75 * vmem_limit_bytes)
        block_b = min(block_b, max(1, (budget - fixed_vmem) // per_example_vmem))

    block_b = int(block_b)
    if block_b >= B:
        block_b = B                      # one block covering the full batch dim
    else:
        # Output block (block_b, E) puts block_b on sublanes: keep it a multiple
        # of 8; the partial last batch block is handled by OOB read/drop-write.
        block_b = max(8, (block_b // 8) * 8)
        block_b = min(block_b, B)

    grid_b = pl.cdiv(B, block_b)

    # Pre-transpose W1 once so the MXU feed is (E on contraction, A on lanes).
    w1_t = w1.T.astype(x.dtype)                         # (E, A)
    w2_r = w2.astype(jnp.float32)                       # (1, A)

    kernel = functools.partial(_self_attn_pool_kernel, epilogue_dtype=epilogue_dtype)

    return pl.pallas_call(
        kernel,
        out_shape=jax.ShapeDtypeStruct((B, E), x.dtype),
        grid_spec=pltpu.PrefetchScalarGridSpec(
            num_scalar_prefetch=0,
            grid=(grid_b,),
            in_specs=[
                pl.BlockSpec((block_b, S, E), lambda b: (b, 0, 0)),  # x stream
                pl.BlockSpec((E, A), lambda b: (0, 0)),              # W1^T resident
                pl.BlockSpec((1, A), lambda b: (0, 0)),              # W2 resident
            ],
            out_specs=pl.BlockSpec((block_b, E), lambda b: (b, 0)),
        ),
        compiler_params=pltpu.CompilerParams(
            dimension_semantics=("parallel",),
            vmem_limit_bytes=vmem_limit_bytes,
        ),
    )(x, w1_t, w2_r)


def _reference(x, w1, w2):
    scores = jnp.tanh(jnp.einsum("bse,ae->bsa", x, w1))
    logits = jnp.einsum("bsa,oa->bso", scores, w2)      # (B, S, 1)
    weights = jax.nn.softmax(logits, axis=1)
    return jnp.sum(x * weights, axis=1)


if __name__ == "__main__":
    B, S, E, A = 2, 8, 32, 16            # attention_size=16 as in the module

    key = jax.random.PRNGKey(0)
    kx, k1, k2 = jax.random.split(key, 3)

    x = jax.random.normal(kx, (B, S, E), dtype=jnp.float32)

    # Deterministic weights mimicking nn.Linear default init (U(+/-1/sqrt(fan_in))).
    bound1 = 1.0 / (E ** 0.5)
    w1 = jax.random.uniform(k1, (A, E), minval=-bound1, maxval=bound1,
                            dtype=jnp.float32)
    bound2 = 1.0 / (A ** 0.5)
    w2 = jax.random.uniform(k2, (1, A), minval=-bound2, maxval=bound2,
                            dtype=jnp.float32)

    out = jax.block_until_ready(self_attention_pooling(x, w1, w2))
    ref = _reference(x, w1, w2)

    assert out.shape == (B, E), out.shape
    # Softmax normalization is now an exact divide; the only remaining source
    # of deviation is that f32 matmuls may run at the MXU's default (bf16-pass)
    # precision inside the kernel while the XLA reference uses its own default
    # passes (worst case a few e-3 here).  1e-2 covers that while still
    # catching any structural bug (errors would be O(0.1-1)).
    max_err = float(jnp.max(jnp.abs(out - ref)))
    assert max_err < 1e-2, f"mismatch vs reference: max abs err {max_err}"

    print("KERNEL_OK")
</pallas_src>

<mosaic_0001>
module attributes {stable_mosaic.version = 11 : i64} {
  func.func @_self_attn_pool_kernel(%arg0: i32, %arg1: memref<2x8x32xf32, #tpu.memory_space<vmem>>, %arg2: memref<32x16xf32, #tpu.memory_space<vmem>>, %arg3: memref<1x16xf32, #tpu.memory_space<vmem>>, %arg4: memref<2x32xf32, #tpu.memory_space<vmem>>) attributes {dimension_semantics = [#tpu.dimension_semantics<parallel>], iteration_bounds = array<i64: 1>, scalar_prefetch = 0 : i64, scratch_operands = 0 : i64, tpu.core_type = #tpu.core_type<tc>, window_params = [{transform_indices = @transform_0, window_bounds = array<i64: 2, 8, 32>}, {pipeline_mode = #tpu.pipeline_mode<synchronous>, transform_indices = @transform_1, window_bounds = array<i64: 32, 16>}, {pipeline_mode = #tpu.pipeline_mode<synchronous>, transform_indices = @transform_2, window_bounds = array<i64: 1, 16>}, {transform_indices = @transform_3, window_bounds = array<i64: 2, 32>}]} {
    %c0 = arith.constant 0 : index
    %c0_0 = arith.constant 0 : index
    %c0_1 = arith.constant 0 : index
    %0 = vector.load %arg1[%c0, %c0_0, %c0_1] : memref<2x8x32xf32, #tpu.memory_space<vmem>>, vector<2x8x32xf32>
    %c0_2 = arith.constant 0 : index
    %c0_3 = arith.constant 0 : index
    %1 = vector.load %arg2[%c0_2, %c0_3] : memref<32x16xf32, #tpu.memory_space<vmem>>, vector<32x16xf32>
    %c0_4 = arith.constant 0 : index
    %c0_5 = arith.constant 0 : index
    %2 = vector.load %arg3[%c0_4, %c0_5] : memref<1x16xf32, #tpu.memory_space<vmem>>, vector<1x16xf32>
    %3 = vector.shape_cast %0 : vector<2x8x32xf32> to vector<16x32xf32>
    %cst = arith.constant dense<0.000000e+00> : vector<16x16xf32>
    %4 = tpu.matmul %3, %1, %cst {dimension_numbers = #tpu.dot_dimension_numbers<[1], [0], [0], [1], [0, 0, 1, 1], [], []>} : vector<16x32xf32>, vector<32x16xf32>, vector<16x16xf32> -> vector<16x16xf32>
    %5 = math.tanh %4 : vector<16x16xf32>
    %6 = vector.shape_cast %5 : vector<16x16xf32> to vector<2x8x16xf32>
    %7 = vector.shape_cast %2 : vector<1x16xf32> to vector<1x1x16xf32>
    %8 = vector.broadcast %7 : vector<1x1x16xf32> to vector<2x8x16xf32>
    %9 = arith.mulf %6, %8 : vector<2x8x16xf32>
    %cst_6 = arith.constant dense<0.000000e+00> : vector<2x8xf32>
    %10 = vector.multi_reduction <add>, %9, %cst_6 [2] : vector<2x8x16xf32> to vector<2x8xf32>
    %cst_7 = arith.constant dense<0xFF800000> : vector<2xf32>
    %11 = vector.multi_reduction <maximumf>, %10, %cst_7 [1] : vector<2x8xf32> to vector<2xf32>
    %12 = vector.shape_cast %11 : vector<2xf32> to vector<2x1xf32>
    %13 = vector.broadcast %12 : vector<2x1xf32> to vector<2x8xf32>
    %14 = arith.subf %10, %13 : vector<2x8xf32>
    %15 = math.exp %14 : vector<2x8xf32>
    %cst_8 = arith.constant dense<0.000000e+00> : vector<2xf32>
    %16 = vector.multi_reduction <add>, %15, %cst_8 [1] : vector<2x8xf32> to vector<2xf32>
    %17 = vector.shape_cast %16 : vector<2xf32> to vector<2x1xf32>
    %18 = vector.shape_cast %15 : vector<2x8xf32> to vector<2x1x8xf32>
    "tpu.trace_start"() <{level = 10 : i32, message = "bqs,bse->bqe"}> : () -> ()
    %cst_9 = arith.constant dense<0.000000e+00> : vector<2x1x32xf32>
    %19 = tpu.matmul %18, %0, %cst_9 {dimension_numbers = #tpu.dot_dimension_numbers<[2], [1], [1], [2], [0, 0, 0, 1, 1, 2], [0], [0]>} : vector<2x1x8xf32>, vector<2x8x32xf32>, vector<2x1x32xf32> -> vector<2x1x32xf32>
    "tpu.trace_stop"() : () -> ()
    %20 = vector.shape_cast %19 : vector<2x1x32xf32> to vector<2x32xf32>
    %21 = vector.broadcast %17 : vector<2x1xf32> to vector<2x32xf32>
    %22 = arith.divf %20, %21 : vector<2x32xf32>
    %c0_10 = arith.constant 0 : index
    %c0_11 = arith.constant 0 : index
    %23 = vector.load %arg4[%c0_10, %c0_11] : memref<2x32xf32, #tpu.memory_space<vmem>>, vector<2x32xf32>
    tpu.vector_store %arg4[%c0_10, %c0_11], %22 {strides = array<i32>} : memref<2x32xf32, #tpu.memory_space<vmem>>, vector<2x32xf32>,
    return
  }
  func.func @transform_0(%arg0: i32) -> (i32, i32, i32) {
    %c0_i32 = arith.constant 0 : i32
    %c0_i32_0 = arith.constant 0 : i32
    %c0_i32_1 = arith.constant 0 : i32
    return %arg0, %c0_i32, %c0_i32_0 : i32, i32, i32
  }
  func.func @transform_1(%arg0: i32) -> (i32, i32) {
    %c0_i32 = arith.constant 0 : i32
    %c0_i32_0 = arith.constant 0 : i32
    %c0_i32_1 = arith.constant 0 : i32
    return %c0_i32, %c0_i32_0 : i32, i32
  }
  func.func @transform_2(%arg0: i32) -> (i32, i32) {
    %c0_i32 = arith.constant 0 : i32
    %c0_i32_0 = arith.constant 0 : i32
    %c0_i32_1 = arith.constant 0 : i32
    return %c0_i32, %c0_i32_0 : i32, i32
  }
  func.func @transform_3(%arg0: i32) -> (i32, i32) {
    %c0_i32 = arith.constant 0 : i32
    %c0_i32_0 = arith.constant 0 : i32
    return %arg0, %c0_i32 : i32, i32
  }
}

</mosaic_0001>

<bundles_post_ra>
// kernel: tpu_custom_call.1
= control target key start
LH: loop header
LB: loop body
LE: loop exit
PB: predicated region body
PF: predicated region fallthrough
CT: control target
= control target key end

     0   :  { %vm22_vm0 = vcmask 261120   ;;  %s500_s0 = inlined_call_operand.vmem [shape: f32[2,8,32], index: 0, kind: input, shape index: {}]   ;;  %s501_s1 = inlined_call_operand.vmem [shape: f32[32,16], index: 1, kind: input, shape index: {}]   ;;  %s502_s2 = inlined_call_operand.vmem [shape: f32[1,16], index: 2, kind: input, shape index: {}]   ;;  %s503_s3 = inlined_call_operand.hbm [shape: f32[2,32], index: 3, kind: output, shape index: {}]  }
   0x1   :  { %v17_v0 = vld [vmem:[%s501_s1] sm:$0xff]  ;;  %v18_v1 = vld [vmem:[%s501_s1 + $0x8] sm:$0xff]  ;;  %v19_v2 = vld [vmem:[%s501_s1 + $0x10] sm:$0xff] }
   0x2   :  { %v388_v3 = vpack.c.bf16 %v18_v1, %v17_v0  ;;  %v20_v4 = vld [vmem:[%s501_s1 + $0x18] sm:$0xff]  ;;  %v15_v5 = vld [vmem:[%s500_s0] sm:$0xff] }
   0x3   :  { %v392_v6 = vpack.c.bf16 %v20_v4, %v19_v2  ;;  %375 = vmatprep.mubr.msk.f32.mxu0 %vm22_vm0, %v15_v5 }
   0x4   :  { %8 = vsyncpa [#allocation3], 0  ;;  %389 = vmatprep.subr.bf16.mxu0 %v388_v3  ;;  %v16_v7 = vld [vmem:[%s500_s0 + $0x8] sm:$0xff]  ;;  %v354_v10 = vld [vmem:[%s502_s2] ss:$0 sm:$0xff]  ;;  %vm114_vm1 = vcmask 130048   ;;  %v123_v17 = vlaneseq }
   0x5   :  { %391 = vmatpush3.bf16.msra.mxu0 %v388_v3  ;;  %vm133_vm2 = vcmask 1041409   ;;  %vm136_vm3 = vcmask 58368   ;;  %v438_v27 = vmov 0   ;;  %v439_v28 = vmov 0.0   ;;  %s441_s0 = smov [#allocation2]  }
   0x6   :  { %393 = vmatprep.subr.bf16.mxu0 %v392_v6  ;;  %v124_v18 = vand.u32 127, %v123_v17  ;;  %v126_v19 = vshrl.u32 %v123_v17, 7  ;;  %401 = vset.pattern.permute.xlu0 %v438_v27  ;;  %vm440_vm4 = vmmov 0   ;;  %vm178_vm5 = vcmask 64512   ;;  %s344_s2 = sshll.u32 %s441_s0, 4  ;;  %s345_s2 = int_to_ptr.vmem [resolvable:$true] %s344_s2 }
   0x7   :  { %400 = vset.pattern.permute.xlu1 %v438_v27  ;;  %378 = vmatprep.subr.mxu1 %v439_v28  ;;  %vm336_vm6 = vcmask 254976   ;;  %s414_s25 = scalar_lea.vmem %s345_s2, 32  ;;  %p419_p1 = scmp.lt.s32.totalorder %s345_s2, %s345_s2 }
   0x8   :  { %v127_v21 = vsub.s32 %v124_v18, %v126_v19  ;;  %379 = vmatpush3.msra.mxu1 %v15_v5  ;;  %v143_v29 = vsub.s32 0, %v126_v19  ;;  %v147_v30 = vsub.s32 1, %v126_v19  ;;  %380 = vmatprep.mubr.msk.f32.mxu1 %vm440_vm4, %v439_v28  ;;  %p415_p0 = scmp.ne.s32.totalorder %s345_s2, %s414_s25  ;;  %p420_p2 = scmp.lt.s32.totalorder %s414_s25, %s414_s25 }
   0x9   :  { %395 = vmatpush3.bf16.msra.mxu0 %v392_v6  ;;  %383 = vmatprep.subr.mxu1 %v439_v28 }
   0xa   :  { %p421_p3 = por %p420_p2, %p419_p1 }
   0xc   :  { %376 = vmatmul.mubr.msk.f32.vlgmr.msra.gmra.mrb[0].mxu0 %vm22_vm0, %v16_v7  ;;  %p422_p4 = pnand %p421_p3, %p415_p0 }
  0xdf   :  { %v377_v8 = vpop.f32.mrb[0].mxu0 }
  0xe0   :  { %402 = vtanh.f32 %v377_v8  ;;  %v95_v9 = vpop.f32.mrb[1].mxu0 }
  0xe1   :  { %404 = vtanh.f32 %v95_v9 }
  0xea   :  { %v403_v11 = vpop.eup %402 }
  0xeb   :  { %v405_v12 = vpop.eup %404  ;;  %v113_v15 = vmul.f32 %v403_v11, %v354_v10 }
  0xec   :  { %v112_v13 = vmul.f32 %v405_v12, %v354_v10 }
  0xed   :  { %v118_v16 = vsel %vm114_vm1, %v113_v15, 0.0 }
  0xee   :  { %v115_v14 = vsel %vm114_vm1, %v112_v13, 0.0 }
  0xef   :  { %116 = vadd.xlane.f32.xlu0 %v115_v14 }
  0xf3   :  { %119 = vadd.xlane.f32.xlu0 %v118_v16 }
 0x17c   :  { %v117_v20 = vpop.xlane.xlu0 %116 }
 0x17d   :  { %v128_v23 = vrot.slane %v117_v20, %v127_v21 }
 0x180   :  { %v120_v22 = vpop.xlane.xlu0 %119 }
 0x181   :  { %v132_v24 = vrot.slane %v120_v22, %v127_v21 }
 0x183   :  { %v134_v25 = vsel %vm133_vm2, %v132_v24, %v128_v23 }
 0x184   :  { %v137_v26 = vsel %vm136_vm3, %v134_v25, -inf }
 0x185   :  { %138 = vmax.xlane.f32.xlu1 %v137_v26 }
 0x212   :  { %v139_v31 = vpop.xlane.xlu1 %138 }
 0x213   :  { %v144_v32 = vrot.slane %v139_v31, %v143_v29  ;;  %v148_v33 = vrot.slane %v139_v31, %v147_v30 }
 0x215   :  { %v151_v34 = vsub.f32 %v117_v20, %v144_v32  ;;  %v152_v35 = vsub.f32 %v120_v22, %v148_v33 }
 0x217   :  { %v153_v36 = vmul.f32 1.442695, %v151_v34  ;;  %v155_v37 = vmul.f32 1.442695, %v152_v35 }
 0x219   :  { %406 = vpow2.f32 %v153_v36 }
 0x21a   :  { %408 = vpow2.f32 %v155_v37 }
 0x223   :  { %v407_v38 = vpop.eup %406 }
 0x224   :  { %v409_v39 = vpop.eup %408  ;;  %160 = vperm.xlu1 %400, %v407_v38  }
 0x225   :  { %163 = vperm.xlu0 %401, %v409_v39  }
 0x2a3   :  { %v161_v40 = vpop.permute.xlu1 %160 }
 0x2a4   :  { %v164_v41 = vpop.permute.xlu0 %163  ;;  %v168_v42 = vrot.slane %v161_v40, %v127_v21 }
 0x2a5   :  { %v172_v43 = vrot.slane %v164_v41, %v127_v21 }
 0x2a6   :  { %381 = vmatmul.mubr.msk.f32.vlgmr.msra.gmra.mrb[0].mxu1 %vm178_vm5, %v168_v42 }
 0x2a7   :  { %384 = vmatpush3.msra.mxu1 %v16_v7  ;;  %v173_v44 = vsel %vm133_vm2, %v172_v43, %v168_v42  ;;  %385 = vmatprep.mubr.msk.f32.mxu1 %vm440_vm4, %v439_v28 }
 0x2a8   :  { %v175_v45 = vsel %vm136_vm3, %v173_v44, 0.0 }
 0x2a9   :  { %176 = vadd.xlane.f32.xlu1 %v175_v45 }
 0x2aa   :  { %386 = vmatmul.mubr.msk.f32.vlgmr.msra.gmra.mrb[2].mxu1 %vm178_vm5, %v172_v43 }
 0x336   :  { %v177_v46 = vpop.xlane.xlu1 %176 }
 0x337   :  { %v324_v47 = vrot.slane %v177_v46, 1 }
 0x339   :  { %410 = vrcp.f32 %v324_v47 }
 0x33a   :  { %412 = vrcp.f32 %v177_v46 }
 0x343   :  { %v411_v50 = vpop.eup %410 }
 0x344   :  { %v413_v54 = vpop.eup %412 }
 0x379   :  { %v247_v48 = vpop.f32.mrb[0].mxu1 }
 0x37a   :  { %v382_v49 = vpop.f32.mrb[1].mxu1  ;;  %v328_v55 = vmul.f32 %v413_v54, %v247_v48 }
 0x37d   :  { %v319_v51 = vpop.f32.mrb[2].mxu1 }
 0x37e   :  { %v330_v52 = vmul.f32 %v411_v50, %v319_v51  ;;  %v387_v53 = vpop.f32.mrb[3].mxu1 }
 0x380   :  { %v333_v56 = vrot.slane %v330_v52, 7 }
 0x382   :  { %v334_v57 = vsel %vm133_vm2, %v333_v56, %v328_v55 }
 0x383   :  { %337 = vst.msk [vmem:[#allocation2] sm:$0x3] %vm336_vm6, %v334_v57 }
 0x384   :  { %425 = shalt.err (!%p422_p4)
}
 0x385   :  { %s426_s28 = scalar_lea.hbm %s503_s3, 32 }
 0x386   :  { %p427_p5 = scmp.ne.s32.totalorder %s503_s3, %s426_s28  ;;  %p430_p6 = scmp.lt.u32.totalorder %s426_s28, %s503_s3 }
 0x388   :  { %p432_p7 = pnand %p430_p6, %p427_p5 }
 0x38a   :  { %435 = shalt.err (!%p432_p7)
}
 0x38b   :  { %347 = dma.vmem_to_hbm [thread:$0]  %s345_s2, 32, %s503_s3, [#allocation3]  }
 0x38c   :  { %436 = dma.done.wait [#allocation3], 32  }
 0x38d   :  { %437 = vsyncadd [#allocation3], 4294967264 }
 0x38e   :  { %351 = vsyncpa [#allocation3], 1 }

</bundles_post_ra>
